<compile_context>
chip_gen: v7x
topology: tpu7x:2x2x1
jax: 0.10.0
libtpu: 0.0.40
codegen_flags: <defaults>
</compile_context>

<pallas_src>
import functools
import math

import jax
import jax.numpy as jnp
from jax import lax
from jax.experimental import pallas as pl
from jax.experimental.pallas import tpu as pltpu


# ------------------------------- helpers ----------------------------------- #

def _pick_tile(dim, target):
    """Largest tile <= target that divides dim (falls back to the full dim)."""
    if dim <= target:
        return dim
    for t in range(target, 0, -1):
        if dim % t == 0:
            return t
    return dim


def _vmem_limit(block_bytes):
    """Explicit scoped-VMEM budget: blocks x double-buffering + headroom."""
    est = 3 * block_bytes + (8 << 20)
    return int(min(max(est, 16 << 20), 48 << 20))   # safe on v5e/v6e/v7x


# --------------------------- tiled linear kernel ---------------------------- #

def _linear_kernel(x_ref, w_ref, o_ref, acc_ref, *, compute_dtype):
    # x: (tm, tk) activations; w: (tn, tk) PyTorch-layout weight tile.
    @pl.when(pl.program_id(2) == 0)
    def _init():
        acc_ref[...] = jnp.zeros_like(acc_ref)

    acc_ref[...] += lax.dot_general(
        x_ref[...].astype(compute_dtype),
        w_ref[...].astype(compute_dtype),
        (((1,), (1,)), ((), ())),            # contract x dim1 with w dim1 (no .T)
        preferred_element_type=jnp.float32,
    )

    @pl.when(pl.program_id(2) == pl.num_programs(2) - 1)
    def _finalize():
        o_ref[...] = acc_ref[...].astype(o_ref.dtype)


def pallas_linear(x2d, w, *, compute_dtype=jnp.bfloat16, tm=256, tn=256, tk=512):
    """x2d: (M, d_in) @ w.T, with w in PyTorch (d_out, d_in) layout."""
    M, K = x2d.shape
    N, K2 = w.shape
    assert K == K2
    tm, tn, tk = _pick_tile(M, tm), _pick_tile(N, tn), _pick_tile(K, tk)
    grid = (M // tm, N // tn, K // tk)

    isz = x2d.dtype.itemsize
    blk_bytes = (tm * tk + tn * tk + tm * tn) * isz + tm * tn * 4  # + f32 acc

    return pl.pallas_call(
        functools.partial(_linear_kernel, compute_dtype=compute_dtype),
        out_shape=jax.ShapeDtypeStruct((M, N), x2d.dtype),
        grid=grid,
        in_specs=[
            pl.BlockSpec((tm, tk), lambda i, j, k: (i, k)),
            pl.BlockSpec((tn, tk), lambda i, j, k: (j, k)),
        ],
        out_specs=pl.BlockSpec((tm, tn), lambda i, j, k: (i, j)),
        scratch_shapes=[pltpu.VMEM((tm, tn), jnp.float32)],
        compiler_params=pltpu.CompilerParams(
            dimension_semantics=("parallel", "parallel", "arbitrary"),
            vmem_limit_bytes=_vmem_limit(blk_bytes),
        ),
    )(x2d, w)


# ---------------------------- attention kernel ------------------------------ #

def _make_attention_kernel(scale, compute_dtype, return_scores):
    exact = jnp.dtype(compute_dtype) == jnp.dtype(jnp.float32)

    def kernel(q_ref, k_ref, v_ref, mask_ref, o_ref, *score_refs):
        # q_ref: (Sq, Hb, dk), k_ref/v_ref: (Skv, Hb, dk), mask_ref: (Sq, Skv)
        # Fold 1/sqrt(d_k) into the q load (O(S*dk) mul instead of O(S*S)).
        q = jnp.swapaxes(q_ref[...] * scale, 0, 1).astype(compute_dtype)  # (Hb,Sq,dk)
        k = jnp.swapaxes(k_ref[...], 0, 1).astype(compute_dtype)          # (Hb,Skv,dk)
        v = jnp.swapaxes(v_ref[...], 0, 1).astype(compute_dtype)          # (Hb,Skv,dk)
        m = mask_ref[...]                                                  # (Sq,Skv) i8

        s = jnp.einsum("hqd,hkd->hqk", q, k,
                       preferred_element_type=jnp.float32)                 # (Hb,Sq,Skv)
        s = jnp.where(m[None, :, :] == 0, jnp.float32(-1e9), s)

        s_max = jnp.max(s, axis=-1, keepdims=True)
        p = jnp.exp(s - s_max)
        denom = jnp.sum(p, axis=-1, keepdims=True)
        # Exact reciprocal on the f32 verification path, EUP approx on bf16 path.
        p = p * pl.reciprocal(denom, approx=not exact)

        # TODO(synk): dropout on p would go here (identity in eval mode).
        o = jnp.einsum("hqk,hkd->hqd", p.astype(compute_dtype), v,
                       preferred_element_type=jnp.float32)                 # (Hb,Sq,dk)
        o_ref[...] = jnp.swapaxes(o, 0, 1).astype(o_ref.dtype)             # (Sq,Hb,dk)
        if return_scores:
            score_refs[0][...] = p.astype(score_refs[0].dtype)

    return kernel


def _q_index_map(b, hb, qi, channel):
    return (b, qi, channel, hb, 0)


def _kv_index_map(b, hb, qi, channel):
    return (b, 0, channel, hb, 0)


def _mask_index_map(b, hb, qi):
    return (b, 0, qi, 0)


def _out_index_map(b, hb, qi):
    return (b, qi, hb, 0)


def _scores_index_map(b, hb, qi):
    return (b, hb, qi, 0)


def pallas_attention(q5, cq, k5, ck, v5, cv, mask, *, compute_dtype,
                     q_block=512, head_block=None, return_scores=True):
    """Multi-head attention on (B, S, n_channels, h, d_k) projected activations.

    q5/k5/v5 may be the SAME fused array (self-attention): cq/ck/cv select the
    q/k/v channel purely through the BlockSpec index_map (no HBM split/copy).
    """
    B, Sq, _, h, dk = q5.shape
    Skv = k5.shape[1]
    Hb = h if head_block is None else head_block
    assert h % Hb == 0 and (Hb == h or Hb % 8 == 0)   # keep (8,128) tiling legal
    q_blk = _pick_tile(Sq, q_block)
    grid = (B, h // Hb, Sq // q_blk)

    in_specs = [
        pl.BlockSpec((None, q_blk, None, Hb, dk),
                     functools.partial(_q_index_map, channel=cq)),
        pl.BlockSpec((None, Skv, None, Hb, dk),
                     functools.partial(_kv_index_map, channel=ck)),
        pl.BlockSpec((None, Skv, None, Hb, dk),
                     functools.partial(_kv_index_map, channel=cv)),
        pl.BlockSpec((None, None, q_blk, Skv), _mask_index_map),
    ]
    out_specs = [pl.BlockSpec((None, q_blk, Hb, dk), _out_index_map)]
    out_shapes = [jax.ShapeDtypeStruct((B, Sq, h, dk), q5.dtype)]
    if return_scores:
        out_specs.append(pl.BlockSpec((None, Hb, q_blk, Skv), _scores_index_map))
        out_shapes.append(jax.ShapeDtypeStruct((B, h, Sq, Skv), jnp.float32))

    isz = q5.dtype.itemsize
    blk_bytes = ((q_blk + 2 * Skv + q_blk) * Hb * dk * isz       # q, k, v, out
                 + q_blk * Skv * mask.dtype.itemsize             # mask
                 + (Hb * q_blk * Skv * 4 if return_scores else 0)
                 + 4 * Hb * q_blk * Skv * 4)                     # f32 score temps

    kernel = _make_attention_kernel(1.0 / math.sqrt(dk), compute_dtype,
                                    return_scores)
    outs = pl.pallas_call(
        kernel,
        out_shape=tuple(out_shapes),
        grid=grid,
        in_specs=in_specs,
        out_specs=tuple(out_specs),
        compiler_params=pltpu.CompilerParams(
            dimension_semantics=("parallel", "parallel", "parallel"),
            vmem_limit_bytes=_vmem_limit(blk_bytes),
        ),
    )(q5, k5, v5, mask)

    if return_scores:
        return outs[0], outs[1]
    return outs[0], None


# ------------------------------ module wrapper ------------------------------ #

def multihead_attention_block(q, k, v, mask, params, h, *,
                              compute_dtype=jnp.bfloat16, return_scores=True):
    """Forward pass identical to MultiheadAttentionBlock.forward (eval mode)."""
    B, Sq, d_model = q.shape
    d_k = d_model // h

    def project(x, w, n_channels):
        S = x.shape[1]
        y = pallas_linear(x.reshape(B * S, d_model), w, compute_dtype=compute_dtype)
        # (B, S, n, h, d_k): pure reshape of the last dim -- no head transpose.
        return y.reshape(B, S, n_channels, h, d_k)

    # Fuse projections when activations are shared so x is read from HBM once.
    # (Weight concat is small and could be precomputed outside the hot path.)
    if (q is k) and (k is v):                      # self-attention: fused QKV
        w_qkv = jnp.concatenate(
            [params["W_q"], params["W_k"], params["W_v"]], axis=0)
        qkv = project(q, w_qkv, 3)
        q5, k5, v5, cq, ck, cv = qkv, qkv, qkv, 0, 1, 2
    elif k is v:                                   # cross-attention: fused KV
        q5 = project(q, params["W_q"], 1)
        kv = project(k, jnp.concatenate([params["W_k"], params["W_v"]], axis=0), 2)
        q5, k5, v5, cq, ck, cv = q5, kv, kv, 0, 0, 1
    else:                                          # fully distinct q / k / v
        q5 = project(q, params["W_q"], 1)
        k5 = project(k, params["W_k"], 1)
        v5 = project(v, params["W_v"], 1)
        cq, ck, cv = 0, 0, 0

    attn_out, scores = pallas_attention(
        q5, cq, k5, ck, v5, cv, mask,
        compute_dtype=compute_dtype, return_scores=return_scores)

    # (B, Sq, h, d_k) -> (B*Sq, d_model): pure reshape, no transpose.
    out = pallas_linear(attn_out.reshape(B * Sq, h * d_k), params["W_o"],
                        compute_dtype=compute_dtype)
    return out.reshape(B, Sq, d_model), scores


# ------------------------------ reference (jnp) ----------------------------- #

def reference_forward(q, k, v, mask, params, h):
    B, Sq, d_model = q.shape
    d_k = d_model // h
    query = q @ params["W_q"].T
    key = k @ params["W_k"].T
    value = v @ params["W_v"].T
    query = query.reshape(B, Sq, h, d_k).transpose(0, 2, 1, 3)
    key = key.reshape(B, -1, h, d_k).transpose(0, 2, 1, 3)
    value = value.reshape(B, -1, h, d_k).transpose(0, 2, 1, 3)
    scores = query @ jnp.swapaxes(key, -2, -1) / math.sqrt(d_k)
    scores = jnp.where(mask == 0, -1e9, scores)
    scores = jax.nn.softmax(scores, axis=-1)
    x = scores @ value
    x = x.transpose(0, 2, 1, 3).reshape(B, Sq, h * d_k)
    return x @ params["W_o"].T, scores


# ----------------------------------- main ----------------------------------- #

if __name__ == "__main__":
    B, S, d_model, h = 2, 8, 32, 4

    key0 = jax.random.PRNGKey(0)
    kq, kk, kv, kwq, kwk, kwv, kwo, kmask = jax.random.split(key0, 8)

    q = jax.random.normal(kq, (B, S, d_model), dtype=jnp.float32)
    k = jax.random.normal(kk, (B, S, d_model), dtype=jnp.float32)
    v = jax.random.normal(kv, (B, S, d_model), dtype=jnp.float32)

    # PyTorch Linear stores weights as (out_features, in_features); consumed as-is.
    bound = 1.0 / math.sqrt(d_model)
    params = {
        "W_q": jax.random.uniform(kwq, (d_model, d_model), jnp.float32, -bound, bound),
        "W_k": jax.random.uniform(kwk, (d_model, d_model), jnp.float32, -bound, bound),
        "W_v": jax.random.uniform(kwv, (d_model, d_model), jnp.float32, -bound, bound),
        "W_o": jax.random.uniform(kwo, (d_model, d_model), jnp.float32, -bound, bound),
    }

    # int8 0/1 mask (4x less DMA than int32); keep diagonal unmasked.
    mask = jax.random.uniform(kmask, (B, 1, S, S)) > 0.3
    mask = jnp.logical_or(mask, jnp.eye(S, dtype=jnp.bool_)[None, None])
    mask = mask.astype(jnp.int8)

    # --- 1) f32 compute path, distinct q/k/v (exercises the unfused path) ----
    out, scores = multihead_attention_block(q, k, v, mask, params, h,
                                            compute_dtype=jnp.float32)
    out = jax.block_until_ready(out)
    scores = jax.block_until_ready(scores)
    ref_out, ref_scores = reference_forward(q, k, v, mask, params, h)
    assert jnp.allclose(out, ref_out, atol=1e-4, rtol=1e-4), "f32 output mismatch"
    assert jnp.allclose(scores, ref_scores, atol=1e-4, rtol=1e-4), "f32 scores mismatch"

    # --- 2) bf16 MXU fast path, self-attention (fused QKV projection) --------
    out2, scores2 = multihead_attention_block(q, q, q, mask, params, h,
                                              compute_dtype=jnp.bfloat16)
    out2 = jax.block_until_ready(out2)
    scores2 = jax.block_until_ready(scores2)
    ref_out2, ref_scores2 = reference_forward(q, q, q, mask, params, h)
    assert jnp.allclose(out2, ref_out2, atol=2e-2, rtol=2e-2), "bf16 output mismatch"
    assert jnp.allclose(scores2, ref_scores2, atol=2e-2, rtol=2e-2), "bf16 scores mismatch"

    print("KERNEL_OK")
</pallas_src>

<mosaic_0001>
module attributes {stable_mosaic.version = 11 : i64} {
  func.func @_linear_kernel(%arg0: i32, %arg1: i32, %arg2: i32, %arg3: memref<16x32xf32, #tpu.memory_space<vmem>>, %arg4: memref<32x32xf32, #tpu.memory_space<vmem>>, %arg5: memref<16x32xf32, #tpu.memory_space<vmem>>, %arg6: memref<16x32xf32, #tpu.memory_space<vmem>>) attributes {dimension_semantics = [#tpu.dimension_semantics<parallel>, #tpu.dimension_semantics<parallel>, #tpu.dimension_semantics<arbitrary>], iteration_bounds = array<i64: 1, 1, 1>, scalar_prefetch = 0 : i64, scratch_operands = 1 : i64, tpu.core_type = #tpu.core_type<tc>, window_params = [{transform_indices = @transform_0, window_bounds = array<i64: 16, 32>}, {transform_indices = @transform_1, window_bounds = array<i64: 32, 32>}, {transform_indices = @transform_2, window_bounds = array<i64: 16, 32>}]} {
    %c0_i32 = arith.constant 0 : i32
    %0 = arith.cmpi eq, %arg2, %c0_i32 : i32
    %1 = arith.extui %0 : i1 to i32
    %c0_i32_0 = arith.constant 0 : i32
    %2 = arith.cmpi ne, %1, %c0_i32_0 : i32
    scf.if %2 {
      %cst_10 = arith.constant 0.000000e+00 : f32
      %12 = vector.broadcast %cst_10 : f32 to vector<16x32xf32>
      %c0_11 = arith.constant 0 : index
      %c0_12 = arith.constant 0 : index
      %13 = vector.load %arg6[%c0_11, %c0_12] : memref<16x32xf32, #tpu.memory_space<vmem>>, vector<16x32xf32>
      tpu.vector_store %arg6[%c0_11, %c0_12], %12 {strides = array<i32>} : memref<16x32xf32, #tpu.memory_space<vmem>>, vector<16x32xf32>,
    } else {
    }
    %c0 = arith.constant 0 : index
    %c0_1 = arith.constant 0 : index
    %3 = vector.load %arg6[%c0, %c0_1] : memref<16x32xf32, #tpu.memory_space<vmem>>, vector<16x32xf32>
    %c0_2 = arith.constant 0 : index
    %c0_3 = arith.constant 0 : index
    %4 = vector.load %arg3[%c0_2, %c0_3] : memref<16x32xf32, #tpu.memory_space<vmem>>, vector<16x32xf32>
    %c0_4 = arith.constant 0 : index
    %c0_5 = arith.constant 0 : index
    %5 = vector.load %arg4[%c0_4, %c0_5] : memref<32x32xf32, #tpu.memory_space<vmem>>, vector<32x32xf32>
    %cst = arith.constant dense<0.000000e+00> : vector<16x32xf32>
    %6 = tpu.matmul %4, %5, %cst {dimension_numbers = #tpu.dot_dimension_numbers<[1], [1], [0], [0], [0, 0, 1, 0], [], []>} : vector<16x32xf32>, vector<32x32xf32>, vector<16x32xf32> -> vector<16x32xf32>
    %7 = arith.addf %3, %6 : vector<16x32xf32>
    %c0_6 = arith.constant 0 : index
    %c0_7 = arith.constant 0 : index
    %8 = vector.load %arg6[%c0_6, %c0_7] : memref<16x32xf32, #tpu.memory_space<vmem>>, vector<16x32xf32>
    tpu.vector_store %arg6[%c0_6, %c0_7], %7 {strides = array<i32>} : memref<16x32xf32, #tpu.memory_space<vmem>>, vector<16x32xf32>,
    %c0_i32_8 = arith.constant 0 : i32
    %9 = arith.cmpi eq, %arg2, %c0_i32_8 : i32
    %10 = arith.extui %9 : i1 to i32
    %c0_i32_9 = arith.constant 0 : i32
    %11 = arith.cmpi ne, %10, %c0_i32_9 : i32
    scf.if %11 {
      %c0_10 = arith.constant 0 : index
      %c0_11 = arith.constant 0 : index
      %12 = vector.load %arg6[%c0_10, %c0_11] : memref<16x32xf32, #tpu.memory_space<vmem>>, vector<16x32xf32>
      %c0_12 = arith.constant 0 : index
      %c0_13 = arith.constant 0 : index
      %13 = vector.load %arg5[%c0_12, %c0_13] : memref<16x32xf32, #tpu.memory_space<vmem>>, vector<16x32xf32>
      tpu.vector_store %arg5[%c0_12, %c0_13], %12 {strides = array<i32>} : memref<16x32xf32, #tpu.memory_space<vmem>>, vector<16x32xf32>,
    } else {
    }
    return
  }
  func.func @transform_0(%arg0: i32, %arg1: i32, %arg2: i32) -> (i32, i32) {
    %c0_i32 = arith.constant 0 : i32
    return %arg0, %arg2 : i32, i32
  }
  func.func @transform_1(%arg0: i32, %arg1: i32, %arg2: i32) -> (i32, i32) {
    %c0_i32 = arith.constant 0 : i32
    return %arg1, %arg2 : i32, i32
  }
  func.func @transform_2(%arg0: i32, %arg1: i32, %arg2: i32) -> (i32, i32) {
    %c0_i32 = arith.constant 0 : i32
    return %arg0, %arg1 : i32, i32
  }
}

</mosaic_0001>

<bundles_post_ra>
// kernel: tpu_custom_call.1
= control target key start
LH: loop header
LB: loop body
LE: loop exit
PB: predicated region body
PF: predicated region fallthrough
CT: control target
= control target key end

     0   :  { %7 = vsyncpa [#allocation4], 0  ;;  %s367_s0 = inlined_call_operand.hbm [shape: f32[16,32], index: 0, kind: input, shape index: {}]   ;;  %s368_s1 = inlined_call_operand.hbm [shape: f32[32,32], index: 1, kind: input, shape index: {}]   ;;  %s369_s2 = inlined_call_operand.hbm [shape: f32[16,32], index: 2, kind: output, shape index: {}]  }
   0x1   :  { %8 = vsyncpa [#allocation7], 0 }
   0x2   :  { %9 = vsyncpa [#allocation5], 0  ;;  %s291_s9 = smov [#allocation3]   ;;  %s219_s13 = scalar_lea.hbm %s367_s0, 256 }
   0x3   :  { %s15_s10 = sshll.u32 %s291_s9, 4  ;;  %p220_p0 = scmp.ne.s32.totalorder %s367_s0, %s219_s13  ;;  %s16_s10 = int_to_ptr.vmem [resolvable:$true] %s15_s10 }
   0x4   :  { %p223_p1 = scmp.lt.u32.totalorder %s219_s13, %s367_s0 }
   0x6   :  { %p225_p2 = pnand %p223_p1, %p220_p0 }
   0x8   :  { %228 = shalt.err (!%p225_p2)
}
   0x9   :  { %s229_s18 = scalar_lea.vmem %s16_s10, 256  ;;  %p234_p4 = scmp.lt.s32.totalorder %s16_s10, %s16_s10 }
   0xa   :  { %p230_p3 = scmp.ne.s32.totalorder %s16_s10, %s229_s18  ;;  %p235_p5 = scmp.lt.s32.totalorder %s229_s18, %s229_s18 }
   0xc   :  { %p236_p6 = por %p235_p5, %p234_p4 }
   0xe   :  { %p237_p7 = pnand %p236_p6, %p230_p3 }
  0x10   :  { %240 = shalt.err (!%p237_p7)
}
  0x11   :  { %s292_s19 = smov 128   ;;  %s293_s20 = smov 8  }
  0x12   :  { %21 = dma.hbm_to_vmem [thread:$0]  %s367_s0, 256, %s16_s10, [#allocation4], %s292_s19, %s292_s19, %s293_s20  }
  0x13   :  { %s294_s23 = smov [#allocation6]   ;;  %s241_s27 = scalar_lea.hbm %s368_s1, 512 }
  0x14   :  { %s27_s24 = sshll.u32 %s294_s23, 4  ;;  %p242_p8 = scmp.ne.s32.totalorder %s368_s1, %s241_s27  ;;  %s28_s24 = int_to_ptr.vmem [resolvable:$true] %s27_s24 }
  0x15   :  { %p245_p9 = scmp.lt.u32.totalorder %s241_s27, %s368_s1 }
  0x17   :  { %p247_p10 = pnand %p245_p9, %p242_p8 }
  0x19   :  { %250 = shalt.err (!%p247_p10)
}
  0x1a   :  { %s251_s4 = scalar_lea.vmem %s28_s24, 512  ;;  %p256_p12 = scmp.lt.s32.totalorder %s28_s24, %s28_s24 }
  0x1b   :  { %p252_p11 = scmp.ne.s32.totalorder %s28_s24, %s251_s4  ;;  %p257_p13 = scmp.lt.s32.totalorder %s251_s4, %s251_s4 }
  0x1d   :  { %p258_p0 = por %p257_p13, %p256_p12 }
  0x1f   :  { %p259_p1 = pnand %p258_p0, %p252_p11 }
  0x21   :  { %262 = shalt.err (!%p259_p1)
}
  0x22   :  { %33 = dma.hbm_to_vmem [thread:$0]  %s368_s1, 512, %s28_s24, [#allocation7], %s292_s19, %s292_s19, %s293_s20  }
  0x23   :  { %285 = dma.done.wait [#allocation4], 256  }
  0x24   :  { %286 = vsyncadd [#allocation4], 4294967040 }
  0x25   :  { %287 = dma.done.wait [#allocation7], 512  }
  0x26   :  { %288 = vsyncadd [#allocation7], 4294966784  ;;  %vm44_vm0 = vcmask 261120   ;;  %v295_v0 = vmov 0.0   ;;  %v51_v1 = vld [vmem:[#allocation6] sm:$0xff]  ;;  %v52_v2 = vld [vmem:[#allocation6 + $0x8] sm:$0xff] }
  0x27   :  { %46 = vst.msk [vmem:[#allocation2 + $0x8] sm:$0xff] %vm44_vm0, %v295_v0  ;;  %45 = vst.msk [vmem:[#allocation2] sm:$0xff] %vm44_vm0, %v295_v0  ;;  %v53_v3 = vld [vmem:[#allocation6 + $0x10] sm:$0xff]  ;;  %v201_v4 = vpack.c.bf16 %v52_v2, %v51_v1  ;;  %v54_v5 = vld [vmem:[#allocation6 + $0x18] sm:$0xff]  ;;  %s296_s1 = smov [#allocation8]  }
  0x28   :  { %vm202_vm1 = vmpackc.low %vm44_vm0, %vm44_vm0  ;;  %v49_v6 = vld [vmem:[#allocation3] sm:$0xff]  ;;  %v207_v7 = vpack.c.bf16 %v54_v5, %v53_v3  ;;  %v50_v8 = vld [vmem:[#allocation3 + $0x8] sm:$0xff]  ;;  %s165_s6 = sshll.u32 %s296_s1, 4  ;;  %s166_s6 = int_to_ptr.vmem [resolvable:$true] %s165_s6 }
  0x29   :  { %198 = vmatprep.mubr.msk.f32.mxu0 %vm44_vm0, %v49_v6  ;;  %203 = vmatprep.subr.msk.bf16.mxu0 %vm202_vm1, %v201_v4  ;;  %s263_s7 = scalar_lea.vmem %s166_s6, 256  ;;  %p268_p3 = scmp.lt.s32.totalorder %s166_s6, %s166_s6 }
  0x2a   :  { %206 = vmatpush3.bf16.xpose.msk.msra.mxu0 %vm202_vm1, %v201_v4  ;;  %p264_p2 = scmp.ne.s32.totalorder %s166_s6, %s263_s7  ;;  %p269_p4 = scmp.lt.s32.totalorder %s263_s7, %s263_s7 }
  0x2b   :  { %209 = vmatprep.subr.msk.bf16.mxu0 %vm202_vm1, %v207_v7 }
  0x2c   :  { %p270_p5 = por %p269_p4, %p268_p3 }
  0x2e   :  { %v48_v9 = vld [vmem:[#allocation2 + $0x8] sm:$0xff]  ;;  %v47_v10 = vld [vmem:[#allocation2] sm:$0xff]  ;;  %p271_p6 = pnand %p270_p5, %p264_p2 }
  0x32   :  { %212 = vmatpush3.bf16.xpose.msk.msra.mxu0 %vm202_vm1, %v207_v7 }
  0x39   :  { %199 = vmatmul.mubr.msk.f32.vlgmr.msra.gmra.mrb[0].mxu0 %vm44_vm0, %v50_v8 }
 0x10c   :  { %v200_v11 = vpop.f32.mrb[0].mxu0 }
 0x10d   :  { %v150_v12 = vadd.f32 %v200_v11, %v48_v9  ;;  %v140_v13 = vpop.f32.mrb[1].mxu0 }
 0x10e   :  { %v149_v14 = vadd.f32 %v140_v13, %v47_v10 }
 0x10f   :  { %152 = vst.msk [vmem:[#allocation2 + $0x8] sm:$0xff] %vm44_vm0, %v150_v12 }
 0x110   :  { %151 = vst.msk [vmem:[#allocation2] sm:$0xff] %vm44_vm0, %v149_v14 }
 0x116   :  { %v157_v15 = vld [vmem:[#allocation2 + $0x8] sm:$0xff] }
 0x117   :  { %v156_v16 = vld [vmem:[#allocation2] sm:$0xff]  ;;  %159 = vst.msk [vmem:[#allocation8 + $0x8] sm:$0xff] %vm44_vm0, %v157_v15 }
 0x118   :  { %158 = vst.msk [vmem:[#allocation8] sm:$0xff] %vm44_vm0, %v156_v16 }
 0x119   :  { %274 = shalt.err (!%p271_p6)
}
 0x11a   :  { %s275_s10 = scalar_lea.hbm %s369_s2, 256 }
 0x11b   :  { %p276_p7 = scmp.ne.s32.totalorder %s369_s2, %s275_s10  ;;  %p279_p8 = scmp.lt.u32.totalorder %s275_s10, %s369_s2 }
 0x11d   :  { %p281_p9 = pnand %p279_p8, %p276_p7 }
 0x11f   :  { %284 = shalt.err (!%p281_p9)
}
 0x120   :  { %171 = dma.vmem_to_hbm [thread:$0]  %s166_s6, 256, %s369_s2, [#allocation5], %s292_s19, %s292_s19, %s293_s20  }
 0x121   :  { %289 = dma.done.wait [#allocation5], 256  }
 0x122   :  { %290 = vsyncadd [#allocation5], 4294967040 }
 0x123   :  { %175 = vsyncpa [#allocation4], 1 }
 0x124   :  { %176 = vsyncpa [#allocation7], 1 }
 0x125   :  { %177 = vsyncpa [#allocation5], 1 }

</bundles_post_ra>
